<compile_context>
chip_gen: v6e
topology: v6e:2x2x1
jax: 0.10.0
libtpu: 0.0.40
codegen_flags: <defaults>
</compile_context>

<pallas_src>
import jax
import jax.numpy as jnp
from jax.experimental import pallas as pl
from jax.experimental.pallas import tpu as pltpu

_LANES = 1024                  # lane-dense last dim: large multiple of 128
_MAX_TILE_ROWS = 256           # 256 x 1024 x 4B = 1 MiB per f32 tile
_VMEM_BUDGET = 12 * (1 << 20)  # stay under v5e's 16 MiB default scoped VMEM


def _maskflow_kernel(mask_ref, *refs):
    # refs = (flow_ref_0, ..., flow_ref_{n-1}, out_ref)
    *flow_refs, out_ref = refs
    m = mask_ref[...]
    # Mask buckets are disjoint, so a select chain is exactly equivalent to
    # the reference's add-of-selects and removes one VALU add per flow.
    acc = jnp.where(m == 1, flow_refs[0][...],
                    jnp.zeros(out_ref.shape, out_ref.dtype))
    for i, f_ref in enumerate(flow_refs[1:], start=2):
        acc = jnp.where(m == i, f_ref[...], acc)
    out_ref[...] = acc.astype(out_ref.dtype)


def mask_flow(mask, *flows):
    """mask: integer NCHW, flows: float NCHW (all same shape)."""
    assert len(flows) >= 1
    shape = flows[0].shape
    assert mask.shape == shape
    dtype = flows[0].dtype
    for f in flows:
        assert f.shape == shape and f.dtype == dtype

    total = 1
    for d in shape:
        total *= d

    # ---- lane-dense flatten: (total,) -> (rows, 1024) ----------------------
    lanes = _LANES
    padded_total = pl.cdiv(total, lanes) * lanes
    rows = padded_total // lanes

    # ---- tile rows sized against scoped VMEM (all arrays double-buffered) --
    n_arrays = len(flows) + 2  # mask + flows + output
    tile_rows = _MAX_TILE_ROWS
    while tile_rows > 8 and n_arrays * 2 * tile_rows * lanes * 4 > _VMEM_BUDGET:
        tile_rows //= 2
    if rows <= tile_rows:
        tile_rows = rows              # full-extent block: no (8,) divisibility
        padded_rows = rows
    else:
        padded_rows = pl.cdiv(rows, tile_rows) * tile_rows
    grid = padded_rows // tile_rows

    pad = padded_rows * lanes - total

    def _prep(x):
        flat = x.reshape(-1)
        if pad:
            flat = jnp.pad(flat, (0, pad))  # mask pad = 0 -> selects nothing
        return flat.reshape(padded_rows, lanes)

    mask2d = _prep(mask.astype(jnp.int32))
    flows2d = [_prep(f) for f in flows]

    n_in = 1 + len(flows)
    spec = pl.BlockSpec((tile_rows, lanes), lambda i: (i, 0))

    # Scheduling hint for XLA: kernel is mem-bound.
    elems = padded_rows * lanes
    cost = pl.CostEstimate(
        flops=2 * len(flows) * elems,          # compare + select per flow
        transcendentals=0,
        bytes_accessed=(n_in + 1) * elems * 4,  # mask + flows + output
    )

    out2d = pl.pallas_call(
        _maskflow_kernel,
        out_shape=jax.ShapeDtypeStruct((padded_rows, lanes), dtype),
        grid=(grid,),
        in_specs=[spec] * n_in,
        out_specs=spec,
        compiler_params=pltpu.CompilerParams(
            # Row tiles are independent -> shard grid across TCs on megacore.
            dimension_semantics=("parallel",),
        ),
        cost_estimate=cost,
    )(mask2d, *flows2d)

    out = out2d.reshape(-1)
    if pad:
        out = out[:total]
    return out.reshape(shape)


def mask_flow_ref(mask, *flows):
    # Pure-JAX reference (mirrors the PyTorch forward).
    result = jnp.zeros_like(flows[0])
    for i, flow in enumerate(flows):
        result = result + jnp.where(mask == i + 1, flow, jnp.zeros_like(flow))
    return result


if __name__ == "__main__":
    key = jax.random.PRNGKey(0)
    k_mask, k_f1, k_f2 = jax.random.split(key, 3)

    # --- small test (module-sized shapes) -----------------------------------
    B, C, H, W = 2, 4, 16, 16
    num_flows = 2
    # mask values in {0, 1, 2}: 0 selects nothing, 1 -> flow_0, 2 -> flow_1
    mask = jax.random.randint(k_mask, (B, C, H, W), 0, num_flows + 1,
                              dtype=jnp.int32)
    flow0 = jax.random.normal(k_f1, (B, C, H, W), dtype=jnp.float32)
    flow1 = jax.random.normal(k_f2, (B, C, H, W), dtype=jnp.float32)

    out = jax.block_until_ready(mask_flow(mask, flow0, flow1))
    ref = mask_flow_ref(mask, flow0, flow1)
    assert out.shape == ref.shape and out.dtype == ref.dtype
    assert jnp.allclose(out, ref, atol=1e-6, rtol=1e-6), "mismatch vs reference"

    # --- larger test exercising the tiled / padded multi-step-grid path -----
    k_mask2, k_g1, k_g2, k_g3 = jax.random.split(jax.random.PRNGKey(1), 4)
    B2, C2, H2, W2 = 2, 3, 256, 256
    mask_l = jax.random.randint(k_mask2, (B2, C2, H2, W2), 0, 4, dtype=jnp.int32)
    g0 = jax.random.normal(k_g1, (B2, C2, H2, W2), dtype=jnp.float32)
    g1 = jax.random.normal(k_g2, (B2, C2, H2, W2), dtype=jnp.float32)
    g2 = jax.random.normal(k_g3, (B2, C2, H2, W2), dtype=jnp.float32)

    out_l = jax.block_until_ready(mask_flow(mask_l, g0, g1, g2))
    ref_l = mask_flow_ref(mask_l, g0, g1, g2)
    assert jnp.allclose(out_l, ref_l, atol=1e-6, rtol=1e-6), "mismatch (tiled)"

    print("KERNEL_OK")
</pallas_src>

<mosaic_0001>
module attributes {stable_mosaic.version = 11 : i64} {
  func.func @_maskflow_kernel(%arg0: i32, %arg1: memref<2x1024xi32, #tpu.memory_space<vmem>>, %arg2: memref<2x1024xf32, #tpu.memory_space<vmem>>, %arg3: memref<2x1024xf32, #tpu.memory_space<vmem>>, %arg4: memref<2x1024xf32, #tpu.memory_space<vmem>>) attributes {dimension_semantics = [#tpu.dimension_semantics<parallel>], iteration_bounds = array<i64: 1>, scalar_prefetch = 0 : i64, scratch_operands = 0 : i64, tpu.core_type = #tpu.core_type<tc>, window_params = [{transform_indices = @transform_0, window_bounds = array<i64: 2, 1024>}, {transform_indices = @transform_1, window_bounds = array<i64: 2, 1024>}, {transform_indices = @transform_2, window_bounds = array<i64: 2, 1024>}, {transform_indices = @transform_3, window_bounds = array<i64: 2, 1024>}]} {
    %c0 = arith.constant 0 : index
    %c0_0 = arith.constant 0 : index
    %0 = vector.load %arg1[%c0, %c0_0] : memref<2x1024xi32, #tpu.memory_space<vmem>>, vector<2x1024xi32>
    %c1_i32 = arith.constant 1 : i32
    %1 = vector.broadcast %c1_i32 : i32 to vector<2x1024xi32>
    %2 = arith.cmpi eq, %0, %1 : vector<2x1024xi32>
    %c0_1 = arith.constant 0 : index
    %c0_2 = arith.constant 0 : index
    %3 = vector.load %arg2[%c0_1, %c0_2] : memref<2x1024xf32, #tpu.memory_space<vmem>>, vector<2x1024xf32>
    %cst = arith.constant 0.000000e+00 : f32
    %4 = vector.broadcast %cst : f32 to vector<2x1024xf32>
    %5 = arith.select %2, %3, %4 : vector<2x1024xi1>, vector<2x1024xf32>
    %c2_i32 = arith.constant 2 : i32
    %6 = vector.broadcast %c2_i32 : i32 to vector<2x1024xi32>
    %7 = arith.cmpi eq, %0, %6 : vector<2x1024xi32>
    %c0_3 = arith.constant 0 : index
    %c0_4 = arith.constant 0 : index
    %8 = vector.load %arg3[%c0_3, %c0_4] : memref<2x1024xf32, #tpu.memory_space<vmem>>, vector<2x1024xf32>
    %9 = arith.select %7, %8, %5 : vector<2x1024xi1>, vector<2x1024xf32>
    %c0_5 = arith.constant 0 : index
    %c0_6 = arith.constant 0 : index
    %10 = vector.load %arg4[%c0_5, %c0_6] : memref<2x1024xf32, #tpu.memory_space<vmem>>, vector<2x1024xf32>
    tpu.vector_store %arg4[%c0_5, %c0_6], %9 {strides = array<i32>} : memref<2x1024xf32, #tpu.memory_space<vmem>>, vector<2x1024xf32>,
    return
  }
  func.func @transform_0(%arg0: i32) -> (i32, i32) {
    %c0_i32 = arith.constant 0 : i32
    %c0_i32_0 = arith.constant 0 : i32
    return %arg0, %c0_i32 : i32, i32
  }
  func.func @transform_1(%arg0: i32) -> (i32, i32) {
    %c0_i32 = arith.constant 0 : i32
    %c0_i32_0 = arith.constant 0 : i32
    return %arg0, %c0_i32 : i32, i32
  }
  func.func @transform_2(%arg0: i32) -> (i32, i32) {
    %c0_i32 = arith.constant 0 : i32
    %c0_i32_0 = arith.constant 0 : i32
    return %arg0, %c0_i32 : i32, i32
  }
  func.func @transform_3(%arg0: i32) -> (i32, i32) {
    %c0_i32 = arith.constant 0 : i32
    %c0_i32_0 = arith.constant 0 : i32
    return %arg0, %c0_i32 : i32, i32
  }
}

</mosaic_0001>

<bundles_post_ra>
// kernel: tpu_custom_call.1
= control target key start
LH: loop header
LB: loop body
LE: loop exit
PB: predicated region body
PF: predicated region fallthrough
CT: control target
= control target key end

     0   :  { %8 = vsyncpa [#allocation3], 0  ;;  %s208_s0 = inlined_call_operand.hbm [shape: s32[2,1024], index: 0, kind: input, shape index: {}]   ;;  %s209_s1 = inlined_call_operand.hbm [shape: f32[2,1024], index: 1, kind: input, shape index: {}]   ;;  %s210_s2 = inlined_call_operand.hbm [shape: f32[2,1024], index: 2, kind: input, shape index: {}]   ;;  %s211_s3 = inlined_call_operand.hbm [shape: f32[2,1024], index: 3, kind: output, shape index: {}]  }
   0x1   :  { %9 = vsyncpa [#allocation6], 0 }
   0x2   :  { %10 = vsyncpa [#allocation4], 0  ;;  %s172_s12 = smov [#allocation5]   ;;  %s173_s14 = smov [#allocation2]  }
   0x3   :  { %s27_s13 = sshll.u32 %s172_s12, 4  ;;  %s17_s15 = sshll.u32 %s173_s14, 4  ;;  %s28_s13 = int_to_ptr.vmem [resolvable:$true] %s27_s13  ;;  %s18_s15 = int_to_ptr.vmem [resolvable:$true] %s17_s15 }
   0x4   :  { %s94_s16 = scalar_lea.vmem %s28_s13, 256  ;;  %p99_p1 = scmp.lt.s32.totalorder %s28_s13, %s28_s13 }
   0x5   :  { %p95_p0 = scmp.ne.s32.totalorder %s28_s13, %s94_s16  ;;  %p100_p2 = scmp.lt.s32.totalorder %s94_s16, %s94_s16 }
   0x7   :  { %p101_p3 = por %p100_p2, %p99_p1 }
   0x9   :  { %p102_p4 = pnand %p101_p3, %p95_p0 }
   0xb   :  { %105 = shalt.err (!%p102_p4)
}
   0xc   :  { %30 = dma.hbm_to_vmem [thread:$0]  %s209_s1, 256, %s28_s13, [#allocation6]  }
   0xd   :  { %s114_s19 = scalar_lea.vmem %s18_s15, 256  ;;  %p119_p6 = scmp.lt.s32.totalorder %s18_s15, %s18_s15 }
   0xe   :  { %p115_p5 = scmp.ne.s32.totalorder %s18_s15, %s114_s19  ;;  %p120_p7 = scmp.lt.s32.totalorder %s114_s19, %s114_s19 }
  0x10   :  { %p121_p8 = por %p120_p7, %p119_p6 }
  0x12   :  { %p122_p9 = pnand %p121_p8, %p115_p5 }
  0x14   :  { %125 = shalt.err (!%p122_p9)
}
  0x15   :  { %20 = dma.hbm_to_vmem [thread:$0]  %s208_s0, 256, %s18_s15, [#allocation3]  }
  0x16   :  { %s174_s22 = smov [#allocation7]  }
  0x17   :  { %s37_s23 = sshll.u32 %s174_s22, 4  ;;  %s38_s23 = int_to_ptr.vmem [resolvable:$true] %s37_s23 }
  0x18   :  { %s134_s24 = scalar_lea.vmem %s38_s23, 256  ;;  %p139_p11 = scmp.lt.s32.totalorder %s38_s23, %s38_s23 }
  0x19   :  { %p135_p10 = scmp.ne.s32.totalorder %s38_s23, %s134_s24  ;;  %p140_p12 = scmp.lt.s32.totalorder %s134_s24, %s134_s24 }
  0x1b   :  { %p141_p13 = por %p140_p12, %p139_p11 }
  0x1d   :  { %p142_p0 = pnand %p141_p13, %p135_p10 }
  0x1f   :  { %145 = shalt.err (!%p142_p0)
}
  0x20   :  { %40 = dma.hbm_to_vmem [thread:$0]  %s210_s2, 256, %s38_s23, [#allocation6]  }
  0x21   :  { %166 = dma.done.wait [#allocation3], 256  }
  0x22   :  { %167 = vsyncadd [#allocation3], 4294967040 }
  0x23   :  { %168 = dma.done.wait [#allocation6], 512  }
  0x24   :  { %169 = vsyncadd [#allocation6], 4294966784  ;;  %v50_v0 = vld [vmem:[#allocation2] sm:$0xff]  ;;  %v54_v1 = vld [vmem:[#allocation5] sm:$0xff]  ;;  %s175_s0 = smov [#allocation8]  }
  0x25   :  { %v60_v2 = vld [vmem:[#allocation7] sm:$0xff]  ;;  %s72_s26 = sshll.u32 %s175_s0, 4  ;;  %vm52_vm0 = vcmp.eq.s32.totalorder %v50_v0, 1  ;;  %vm58_vm1 = vcmp.eq.s32.totalorder %v50_v0, 2  ;;  %v51_v3 = vld [vmem:[#allocation2 + $0x8] sm:$0xff]  ;;  %v55_v4 = vld [vmem:[#allocation5 + $0x8] sm:$0xff]  ;;  %s73_s26 = int_to_ptr.vmem [resolvable:$true] %s72_s26 }
  0x26   :  { %v61_v5 = vld [vmem:[#allocation7 + $0x8] sm:$0xff]  ;;  %v56_v6 = vsel %vm52_vm0, %v54_v1, 0.0  ;;  %vm53_vm2 = vcmp.eq.s32.totalorder %v51_v3, 1  ;;  %vm59_vm3 = vcmp.eq.s32.totalorder %v51_v3, 2  ;;  %s146_s2 = scalar_lea.vmem %s73_s26, 256  ;;  %p151_p2 = scmp.lt.s32.totalorder %s73_s26, %s73_s26 }
  0x27   :  { %v62_v7 = vsel %vm58_vm1, %v60_v2, %v56_v6  ;;  %v57_v8 = vsel %vm53_vm2, %v55_v4, 0.0  ;;  %p147_p1 = scmp.ne.s32.totalorder %s73_s26, %s146_s2  ;;  %p152_p3 = scmp.lt.s32.totalorder %s146_s2, %s146_s2 }
  0x28   :  { %64 = vst [vmem:[#allocation8] sm:$0xff] %v62_v7  ;;  %v63_v9 = vsel %vm59_vm3, %v61_v5, %v57_v8 }
  0x29   :  { %65 = vst [vmem:[#allocation8 + $0x8] sm:$0xff] %v63_v9  ;;  %p153_p4 = por %p152_p3, %p151_p2 }
  0x2b   :  { %p154_p5 = pnand %p153_p4, %p147_p1 }
  0x2d   :  { %157 = shalt.err (!%p154_p5)
}
  0x2e   :  { %75 = dma.vmem_to_hbm [thread:$0]  %s73_s26, 256, %s211_s3, [#allocation4]  }
  0x2f   :  { %170 = dma.done.wait [#allocation4], 256  }
  0x30   :  { %171 = vsyncadd [#allocation4], 4294967040 }
  0x31   :  { %79 = vsyncpa [#allocation3], 1 }
  0x32   :  { %80 = vsyncpa [#allocation6], 1 }
  0x33   :  { %81 = vsyncpa [#allocation4], 1 }

</bundles_post_ra>
